<compile_context>
chip_gen: v7x
topology: tpu7x:2x2x1
jax: 0.10.0
libtpu: 0.0.40
codegen_flags: <defaults>
</compile_context>

<pallas_src>
import functools

import jax
import jax.numpy as jnp
from jax.experimental import pallas as pl
from jax.experimental.pallas import tpu as pltpu


def _round_up(x: int, m: int) -> int:
    return ((x + m - 1) // m) * m


def _gaussian_kernel(d_ref, o_ref, *, neg_inv_two_var: float):
    d = d_ref[...].astype(jnp.float32)
    # (d * d) * c on the VPU; exp on the EUP (separate bundle slot) — free filler
    # under the HBM-bound roofline.
    o_ref[...] = jnp.exp((d * d) * neg_inv_two_var).astype(o_ref.dtype)


def _gaussian_2d(x, neg_inv_two_var: float, target_tile_bytes: int):
    """Elementwise gaussian on a 2-D array with byte-budgeted 2-D tiling."""
    R, C = x.shape
    itemsize = jnp.dtype(x.dtype).itemsize
    # dtype-aware native sublane multiple: f32 -> 8, bf16 -> 16, int8/fp8 -> 32
    sublane = {4: 8, 2: 16, 1: 32}.get(itemsize, 8)
    LANE = 128

    # Lane (last-dim) tile: keep full C unless it is both large and 128-divisible.
    max_lane_tile = 2048
    if C > max_lane_tile and C % LANE == 0:
        tc = max_lane_tile
    else:
        tc = C  # full extent is always a legal block dim

    # Row tile by VMEM byte budget (~1-4 MiB per tile buffer sweet spot).
    tr = max(sublane, (target_tile_bytes // (itemsize * tc)) // sublane * sublane)
    if tr >= R:
        tr = R  # full extent is always legal, regardless of alignment

    # v7x megacore: ensure >= 2 parallel grid steps for non-trivial inputs so both
    # TensorCores (and their DMA/HBM throughput) are used.
    total_bytes = R * C * itemsize
    if pl.cdiv(R, tr) * pl.cdiv(C, tc) == 1 and total_bytes > (1 << 20) and R > sublane:
        tr_half = _round_up(-(-R // 2), sublane)
        if tr_half < R:
            tr = tr_half

    grid = (pl.cdiv(R, tr), pl.cdiv(C, tc))

    tile_bytes = tr * tc * itemsize
    # in + out, double-buffered, plus headroom; capped well under physical VMEM.
    vmem_limit = int(min(48 << 20, max(16 << 20, 4 * tile_bytes + (4 << 20))))

    kernel = functools.partial(_gaussian_kernel, neg_inv_two_var=neg_inv_two_var)

    return pl.pallas_call(
        kernel,
        out_shape=jax.ShapeDtypeStruct((R, C), x.dtype),
        grid=grid,
        in_specs=[pl.BlockSpec((tr, tc), lambda i, j: (i, j))],
        out_specs=pl.BlockSpec((tr, tc), lambda i, j: (i, j)),
        compiler_params=pltpu.CompilerParams(
            dimension_semantics=("parallel", "parallel"),
            vmem_limit_bytes=vmem_limit,
        ),
        cost_estimate=pl.CostEstimate(
            flops=2 * R * C,
            transcendentals=R * C,
            bytes_accessed=2 * R * C * itemsize,
        ),
    )(x)


def gaussian_prior_forward(distances, variance, *, target_tile_bytes=2 << 20):
    """GaussianPrior.forward: exp(-(distances**2) / (2*variance)), same shape/dtype."""
    B, P = distances.shape
    # variance is a static Python hyperparameter of the module (raises if traced).
    neg_inv_two_var = -1.0 / (2.0 * float(variance))

    if P >= 128:
        return _gaussian_2d(distances, neg_inv_two_var, target_tile_bytes)

    # Small-P (typical prototorch: tens of prototypes): flatten + pad into a
    # lane-dense slab so every vreg carries full useful lanes and stores are
    # unmasked.  Purely layout plumbing — the op is elementwise.
    n = B * P
    width = min(512, _round_up(n, 128))
    rows = -(-n // width)
    pad = rows * width - n
    flat = distances.reshape(-1)
    if pad:
        flat = jnp.pad(flat, (0, pad))
    out2d = _gaussian_2d(flat.reshape(rows, width), neg_inv_two_var, target_tile_bytes)
    return out2d.reshape(-1)[:n].reshape(B, P)


def _reference_forward(distances, variance):
    import numpy as np
    d = np.asarray(distances, dtype=np.float64)
    return np.exp(-(d * d) / (2.0 * float(variance)))


if __name__ == "__main__":
    import numpy as np

    variance = 2.0
    key = jax.random.PRNGKey(0)
    k1, k2 = jax.random.split(key)

    # Case 1: typical prototorch shape — small, non-128-aligned prototype count
    # (exercises the lane-dense flatten/pad path).
    batch, num_prototypes = 8, 12
    d_small = jax.random.uniform(
        k1, (batch, num_prototypes), dtype=jnp.float32, minval=0.0, maxval=4.0)
    out_small = gaussian_prior_forward(d_small, variance)
    jax.block_until_ready(out_small)
    np.testing.assert_allclose(
        np.asarray(out_small), _reference_forward(d_small, variance),
        rtol=1e-6, atol=1e-6)

    # Case 2: lane-dense prototype count (exercises the direct 2-D tiled path).
    d_wide = jax.random.uniform(
        k2, (8, 256), dtype=jnp.float32, minval=0.0, maxval=4.0)
    out_wide = gaussian_prior_forward(d_wide, variance)
    jax.block_until_ready(out_wide)
    np.testing.assert_allclose(
        np.asarray(out_wide), _reference_forward(d_wide, variance),
        rtol=1e-6, atol=1e-6)

    print("KERNEL_OK")
</pallas_src>

<mosaic_0001>
module attributes {stable_mosaic.version = 11 : i64} {
  func.func @_gaussian_kernel(%arg0: i32, %arg1: i32, %arg2: memref<1x128xf32, #tpu.memory_space<vmem>>, %arg3: memref<1x128xf32, #tpu.memory_space<vmem>>) attributes {dimension_semantics = [#tpu.dimension_semantics<parallel>, #tpu.dimension_semantics<parallel>], iteration_bounds = array<i64: 1, 1>, scalar_prefetch = 0 : i64, scratch_operands = 0 : i64, tpu.core_type = #tpu.core_type<tc>, window_params = [{transform_indices = @transform_0, window_bounds = array<i64: 1, 128>}, {transform_indices = @transform_1, window_bounds = array<i64: 1, 128>}]} {
    %c0 = arith.constant 0 : index
    %c0_0 = arith.constant 0 : index
    %0 = vector.load %arg2[%c0, %c0_0] : memref<1x128xf32, #tpu.memory_space<vmem>>, vector<1x128xf32>
    %1 = arith.mulf %0, %0 : vector<1x128xf32>
    %cst = arith.constant -2.500000e-01 : f32
    %2 = vector.broadcast %cst : f32 to vector<1x128xf32>
    %3 = arith.mulf %1, %2 : vector<1x128xf32>
    %4 = math.exp %3 : vector<1x128xf32>
    %c0_1 = arith.constant 0 : index
    %c0_2 = arith.constant 0 : index
    %5 = vector.load %arg3[%c0_1, %c0_2] : memref<1x128xf32, #tpu.memory_space<vmem>>, vector<1x128xf32>
    tpu.vector_store %arg3[%c0_1, %c0_2], %4 {strides = array<i32>} : memref<1x128xf32, #tpu.memory_space<vmem>>, vector<1x128xf32>,
    return
  }
  func.func @transform_0(%arg0: i32, %arg1: i32) -> (i32, i32) {
    %c0_i32 = arith.constant 0 : i32
    return %arg0, %arg1 : i32, i32
  }
  func.func @transform_1(%arg0: i32, %arg1: i32) -> (i32, i32) {
    %c0_i32 = arith.constant 0 : i32
    return %arg0, %arg1 : i32, i32
  }
}

</mosaic_0001>

<bundles_post_ra>
// kernel: tpu_custom_call.1
= control target key start
LH: loop header
LB: loop body
LE: loop exit
PB: predicated region body
PF: predicated region fallthrough
CT: control target
= control target key end

     0   :  { %6 = vsyncpa [#allocation3], 0  ;;  %s130_s0 = inlined_call_operand.hbm [shape: f32[1,128], index: 0, kind: input, shape index: {}]   ;;  %s131_s1 = inlined_call_operand.hbm [shape: f32[1,128], index: 1, kind: output, shape index: {}]  }
   0x1   :  { %7 = vsyncpa [#allocation4], 0  ;;  %s94_s6 = smov [#allocation2]   ;;  %s46_s10 = scalar_lea.hbm %s130_s0, 16 }
   0x2   :  { %s14_s7 = sshll.u32 %s94_s6, 4  ;;  %p47_p0 = scmp.ne.s32.totalorder %s130_s0, %s46_s10  ;;  %s15_s7 = int_to_ptr.vmem [resolvable:$true] %s14_s7 }
   0x3   :  { %p50_p1 = scmp.lt.u32.totalorder %s46_s10, %s130_s0 }
   0x5   :  { %p52_p2 = pnand %p50_p1, %p47_p0 }
   0x7   :  { %55 = shalt.err (!%p52_p2)
}
   0x8   :  { %s56_s15 = scalar_lea.vmem %s15_s7, 16  ;;  %s60_s16 = scalar_lea.vmem %s15_s7, 32 }
   0x9   :  { %p57_p3 = scmp.ne.s32.totalorder %s15_s7, %s56_s15  ;;  %p61_p4 = scmp.lt.s32.totalorder %s15_s7, %s15_s7 }
   0xa   :  { %p62_p5 = scmp.lt.s32.totalorder %s60_s16, %s56_s15 }
   0xc   :  { %p63_p6 = por %p62_p5, %p61_p4 }
   0xe   :  { %p64_p7 = pnand %p63_p6, %p57_p3 }
  0x10   :  { %67 = shalt.err (!%p64_p7)
}
  0x11   :  { %17 = dma.hbm_to_vmem [thread:$0]  %s130_s0, 16, %s15_s7, [#allocation3]  }
  0x12   :  { %90 = dma.done.wait [#allocation3], 16  }
  0x13   :  { %91 = vsyncadd [#allocation3], 4294967280  ;;  %v21_v0 = vld [vmem:[#allocation2] sm:$0x1]  ;;  %s95_s19 = smov [#allocation5]  }
  0x14   :  { %v22_v1 = vmul.f32 %v21_v0, %v21_v0  ;;  %s33_s20 = sshll.u32 %s95_s19, 4  ;;  %s34_s20 = int_to_ptr.vmem [resolvable:$true] %s33_s20 }
  0x15   :  { %s68_s21 = scalar_lea.vmem %s34_s20, 16  ;;  %s72_s22 = scalar_lea.vmem %s34_s20, 32 }
  0x16   :  { %v23_v2 = vmul.f32 -0.25, %v22_v1  ;;  %p69_p8 = scmp.ne.s32.totalorder %s34_s20, %s68_s21  ;;  %p73_p9 = scmp.lt.s32.totalorder %s34_s20, %s34_s20 }
  0x17   :  { %p74_p10 = scmp.lt.s32.totalorder %s72_s22, %s68_s21 }
  0x18   :  { %v24_v3 = vmul.f32 1.442695, %v23_v2 }
  0x19   :  { %p75_p11 = por %p74_p10, %p73_p9 }
  0x1a   :  { %44 = vpow2.f32 %v24_v3 }
  0x1b   :  { %p76_p12 = pnand %p75_p11, %p69_p8 }
  0x24   :  { %v45_v4 = vpop.eup %44 }
  0x25   :  { %26 = vst [vmem:[#allocation5] sm:$0x1] %v45_v4 }
  0x26   :  { %79 = shalt.err (!%p76_p12)
}
  0x27   :  { %s80_s24 = scalar_lea.hbm %s131_s1, 16 }
  0x28   :  { %p81_p13 = scmp.ne.s32.totalorder %s131_s1, %s80_s24  ;;  %p84_p0 = scmp.lt.u32.totalorder %s80_s24, %s131_s1 }
  0x2a   :  { %p86_p1 = pnand %p84_p0, %p81_p13 }
  0x2c   :  { %89 = shalt.err (!%p86_p1)
}
  0x2d   :  { %36 = dma.vmem_to_hbm [thread:$0]  %s34_s20, 16, %s131_s1, [#allocation4]  }
  0x2e   :  { %92 = dma.done.wait [#allocation4], 16  }
  0x2f   :  { %93 = vsyncadd [#allocation4], 4294967280 }
  0x30   :  { %40 = vsyncpa [#allocation3], 1 }
  0x31   :  { %41 = vsyncpa [#allocation4], 1 }

</bundles_post_ra>
